<compile_context>
chip_gen: v6e
topology: v6e:2x2x1
jax: 0.10.0
libtpu: 0.0.40
codegen_flags: <defaults>
</compile_context>

<pallas_src>
import functools
import numpy as np
import jax
import jax.numpy as jnp
from jax.experimental import pallas as pl
from jax.experimental.pallas import tpu as pltpu


MXU_DTYPE = jnp.float32   # set to jnp.bfloat16 on v6e/v7x for higher MXU throughput


# ----------------------------------------------------------------------------
# helpers
# ----------------------------------------------------------------------------
def _row_tile(M, target=512):
    """Largest row tile <= target that divides M and keeps sublane (8) alignment."""
    if M <= target:
        return M
    for t in range(min(target, M), 7, -1):
        if M % t == 0 and t % 8 == 0:
            return t
    return M


def _pick_div(n, target):
    """Largest divisor of n that is <= target (>= 1)."""
    b = max(1, min(n, target))
    while n % b != 0:
        b -= 1
    return b


def _parallel(n_axes=1, vmem_bytes=None):
    return pltpu.CompilerParams(
        dimension_semantics=("parallel",) * n_axes,
        vmem_limit_bytes=vmem_bytes,
    )


def _erf(x):
    # Abramowitz & Stegun 7.1.26 rational approximation (|err| < 1.5e-7 ~ f32 eps).
    a1, a2, a3, a4, a5 = 0.254829592, -0.284496736, 1.421413741, -1.453152027, 1.061405429
    p = 0.3275911
    s = jnp.sign(x)
    ax = jnp.abs(x)
    t = 1.0 / (1.0 + p * ax)
    y = 1.0 - (((((a5 * t + a4) * t + a3) * t + a2) * t + a1) * t) * jnp.exp(-ax * ax)
    return s * y


def _gelu_exact(x):
    # matches torch.nn.GELU() default (erf formulation)
    return 0.5 * x * (1.0 + _erf(x * 0.7071067811865476))


def _layernorm_f32(x, g, b, eps=1e-5):
    mu = jnp.mean(x, axis=-1, keepdims=True)
    var = jnp.mean(jnp.square(x - mu), axis=-1, keepdims=True)
    return (x - mu) * jax.lax.rsqrt(var + eps) * g + b


# ----------------------------------------------------------------------------
# fused dense kernels (row-tiled, weights VMEM-resident)
# ----------------------------------------------------------------------------
def _ln_linear_kernel(x_ref, g_ref, b_ref, w_ref, o_ref):
    # out = LayerNorm(x) @ w      (norm1 + qkv; qkv has no bias)
    x = x_ref[...].astype(jnp.float32)
    y = _layernorm_f32(x, g_ref[...].astype(jnp.float32), b_ref[...].astype(jnp.float32))
    acc = jnp.dot(y.astype(MXU_DTYPE), w_ref[...].astype(MXU_DTYPE),
                  preferred_element_type=jnp.float32)
    o_ref[...] = acc.astype(o_ref.dtype)


def _linear_ln_kernel(x_ref, w_ref, g_ref, b_ref, o_ref):
    # out = LayerNorm(x @ w)      (lk -> norm4; lk has no bias)
    acc = jnp.dot(x_ref[...].astype(MXU_DTYPE), w_ref[...].astype(MXU_DTYPE),
                  preferred_element_type=jnp.float32)
    o_ref[...] = _layernorm_f32(acc, g_ref[...].astype(jnp.float32),
                                b_ref[...].astype(jnp.float32)).astype(o_ref.dtype)


def _proj_res_ln_mlp_kernel(*refs, nb):
    # t   = x + concat(branches) @ Wp + bp          (proj + residual, concat folded)
    # out = t + fc2(GELU(fc1(LayerNorm(t))))        (norm2 + MLP + residual)
    x_ref = refs[0]
    a_refs = refs[1:1 + nb]
    pw_refs = refs[1 + nb:1 + 2 * nb]
    (pb_ref, g_ref, b_ref, w1_ref, b1_ref, w2_ref, b2_ref, o_ref) = refs[1 + 2 * nb:]
    t = x_ref[...].astype(jnp.float32) + pb_ref[...].astype(jnp.float32)
    for a_ref, pw_ref in zip(a_refs, pw_refs):
        t = t + jnp.dot(a_ref[...].astype(MXU_DTYPE), pw_ref[...].astype(MXU_DTYPE),
                        preferred_element_type=jnp.float32)
    y = _layernorm_f32(t, g_ref[...].astype(jnp.float32), b_ref[...].astype(jnp.float32))
    h = jnp.dot(y.astype(MXU_DTYPE), w1_ref[...].astype(MXU_DTYPE),
                preferred_element_type=jnp.float32) + b1_ref[...].astype(jnp.float32)
    h = _gelu_exact(h)
    o = jnp.dot(h.astype(MXU_DTYPE), w2_ref[...].astype(MXU_DTYPE),
                preferred_element_type=jnp.float32) + b2_ref[...].astype(jnp.float32)
    o_ref[...] = (t + o).astype(o_ref.dtype)


def ln_linear_pallas(x, g, b, w, row_tile=512):
    lead, C = x.shape[:-1], x.shape[-1]
    N = w.shape[-1]
    M = int(np.prod(lead))
    TM = _row_tile(M, row_tile)
    resident = lambda shape: pl.BlockSpec(shape, lambda i: (0,) * len(shape))
    out = pl.pallas_call(
        _ln_linear_kernel,
        grid=(M // TM,),
        in_specs=[pl.BlockSpec((TM, C), lambda i: (i, 0)),
                  resident((1, C)), resident((1, C)), resident((C, N))],
        out_specs=pl.BlockSpec((TM, N), lambda i: (i, 0)),
        out_shape=jax.ShapeDtypeStruct((M, N), x.dtype),
        compiler_params=_parallel(),
    )(x.reshape(M, C), g.reshape(1, C), b.reshape(1, C), w)
    return out.reshape(lead + (N,))


def linear_ln_pallas(x, w, g, b, row_tile=512):
    lead, K = x.shape[:-1], x.shape[-1]
    N = w.shape[-1]
    M = int(np.prod(lead))
    TM = _row_tile(M, row_tile)
    resident = lambda shape: pl.BlockSpec(shape, lambda i: (0,) * len(shape))
    out = pl.pallas_call(
        _linear_ln_kernel,
        grid=(M // TM,),
        in_specs=[pl.BlockSpec((TM, K), lambda i: (i, 0)),
                  resident((K, N)), resident((1, N)), resident((1, N))],
        out_specs=pl.BlockSpec((TM, N), lambda i: (i, 0)),
        out_shape=jax.ShapeDtypeStruct((M, N), x.dtype),
        compiler_params=_parallel(),
    )(x.reshape(M, K), w, g.reshape(1, N), b.reshape(1, N))
    return out.reshape(lead + (N,))


def proj_res_ln_mlp_pallas(x, branches, proj_w, proj_b, g, b, w1, b1, w2, b2,
                           row_tile=256):
    """x + proj(concat(branches)) followed by + MLP(norm2(...)), all in one kernel.

    The channel-concat of the attention branches is folded into row-split proj
    weights so the concatenated tensor and the post-proj tensor never hit HBM.
    """
    B, L, C = x.shape
    Hd = w1.shape[-1]
    M = B * L
    TM = _row_tile(M, row_tile)
    nb = len(branches)
    widths = [int(br.shape[-1]) for br in branches]
    offs = [0]
    for w_ in widths:
        offs.append(offs[-1] + w_)
    resident = lambda shape: pl.BlockSpec(shape, lambda i: (0,) * len(shape))

    ins = [x.reshape(M, C)]
    in_specs = [pl.BlockSpec((TM, C), lambda i: (i, 0))]
    for br, w_ in zip(branches, widths):
        ins.append(br.reshape(M, w_))
        in_specs.append(pl.BlockSpec((TM, w_), lambda i: (i, 0)))
    for i in range(nb):
        ins.append(proj_w[offs[i]:offs[i + 1], :])
        in_specs.append(resident((widths[i], C)))
    ins += [proj_b.reshape(1, C), g.reshape(1, C), b.reshape(1, C),
            w1, b1.reshape(1, Hd), w2, b2.reshape(1, C)]
    in_specs += [resident((1, C)), resident((1, C)), resident((1, C)),
                 resident((C, Hd)), resident((1, Hd)),
                 resident((Hd, C)), resident((1, C))]

    out = pl.pallas_call(
        functools.partial(_proj_res_ln_mlp_kernel, nb=nb),
        grid=(M // TM,),
        in_specs=in_specs,
        out_specs=pl.BlockSpec((TM, C), lambda i: (i, 0)),
        out_shape=jax.ShapeDtypeStruct((M, C), x.dtype),
        compiler_params=_parallel(vmem_bytes=32 * 1024 * 1024),
    )(*ins)
    return out.reshape(B, L, C)


# ----------------------------------------------------------------------------
# window attention kernel (windows batched per step, heads merged on lanes)
# ----------------------------------------------------------------------------
def _attn_kernel(*refs, scale, nh, hd, use_lepe):
    if use_lepe:
        q_ref, k_ref, v_ref, lepe_ref, o_ref = refs
    else:
        q_ref, k_ref, v_ref, o_ref = refs
        lepe_ref = None
    q = q_ref[...].astype(jnp.float32) * scale        # (Wb, win, C), lane-dense
    k = k_ref[...].astype(jnp.float32)
    v = v_ref[...].astype(jnp.float32)
    dn_qk = (((2,), (2,)), ((0,), (0,)))              # q @ k^T, no materialized transpose
    dn_pv = (((2,), (1,)), ((0,), (0,)))
    head_outs = []
    for h in range(nh):                               # heads live on static lane slices
        sl = slice(h * hd, (h + 1) * hd)
        s = jax.lax.dot_general(q[:, :, sl], k[:, :, sl], dn_qk,
                                preferred_element_type=jnp.float32)
        s = s - jnp.max(s, axis=-1, keepdims=True)
        e = jnp.exp(s)
        p = e * pl.reciprocal(jnp.sum(e, axis=-1, keepdims=True), approx=True)
        head_outs.append(jax.lax.dot_general(p, v[:, :, sl], dn_pv,
                                             preferred_element_type=jnp.float32))
    out = jnp.concatenate(head_outs, axis=-1)         # (Wb, win, C) lane-dense store
    if use_lepe:
        out = out + lepe_ref[...].astype(jnp.float32)
    o_ref[...] = out.astype(o_ref.dtype)


def window_attention_pallas(q, k, v, lepe, scale, num_heads, use_lepe,
                            vmem_budget=2 * 1024 * 1024):
    # q, k, v[, lepe]: (nW, win, C) with heads merged contiguously on the channel axis.
    nW, win, C = q.shape
    hd = C // num_heads
    per_win = win * C * 4 * 5                         # q,k,v,lepe,out in f32
    Wb = _pick_div(nW, max(1, vmem_budget // per_win))
    blk = pl.BlockSpec((Wb, win, C), lambda i: (i, 0, 0))
    ins, in_specs = [q, k, v], [blk, blk, blk]
    if use_lepe:                                      # idx==0 branch: skip the DMA entirely
        ins.append(lepe)
        in_specs.append(blk)
    out = pl.pallas_call(
        functools.partial(_attn_kernel, scale=scale, nh=num_heads, hd=hd, use_lepe=use_lepe),
        grid=(nW // Wb,),
        in_specs=in_specs,
        out_specs=blk,
        out_shape=jax.ShapeDtypeStruct((nW, win, C), q.dtype),
        compiler_params=_parallel(),
    )(*ins)
    return out


# ----------------------------------------------------------------------------
# LePE depthwise 3x3 conv (NHWC, batched over windows)
# ----------------------------------------------------------------------------
def _dwconv_kernel(x_ref, w_ref, b_ref, o_ref, *, H, W):
    xp = x_ref[...].astype(jnp.float32)               # (Wb, H+2, W+2, C)
    w = w_ref[...].astype(jnp.float32)                # (3, 3, C)
    acc = jnp.zeros(o_ref.shape, jnp.float32)
    for dy in range(3):
        for dx in range(3):
            acc = acc + xp[:, dy:dy + H, dx:dx + W, :] * w[dy:dy + 1, dx:dx + 1, :]
    o_ref[...] = (acc + b_ref[...].astype(jnp.float32)).astype(o_ref.dtype)


def dwconv_pallas(x_nhwc, w, b, vmem_budget=2 * 1024 * 1024):
    # depthwise 3x3, stride 1, pad 1 per window (== Conv2d(C, C, 3, 1, 1, groups=C))
    nW, H, W, C = x_nhwc.shape
    xp = jnp.pad(x_nhwc, ((0, 0), (1, 1), (1, 1), (0, 0)))
    per_win = (H + 2) * (W + 2) * C * 4 * 2
    Wb = _pick_div(nW, max(1, vmem_budget // per_win))
    out = pl.pallas_call(
        functools.partial(_dwconv_kernel, H=H, W=W),
        grid=(nW // Wb,),
        in_specs=[pl.BlockSpec((Wb, H + 2, W + 2, C), lambda i: (i, 0, 0, 0)),
                  pl.BlockSpec((3, 3, C), lambda i: (0, 0, 0)),
                  pl.BlockSpec((1, C), lambda i: (0, 0))],
        out_specs=pl.BlockSpec((Wb, H, W, C), lambda i: (i, 0, 0, 0)),
        out_shape=jax.ShapeDtypeStruct((nW, H, W, C), x_nhwc.dtype),
        compiler_params=_parallel(),
    )(xp, w, b.reshape(1, C))
    return out


# ----------------------------------------------------------------------------
# window partition / merge glue (channel-last; C never leaves the lane axis)
# ----------------------------------------------------------------------------
def window_partition(x, H, W, H_sp, W_sp):
    # (B, H*W, C) -> (B * (H//H_sp) * (W//W_sp), H_sp*W_sp, C); matches img2windows ordering.
    B, L, C = x.shape
    x = x.reshape(B, H // H_sp, H_sp, W // W_sp, W_sp, C)
    x = x.transpose(0, 1, 3, 2, 4, 5).reshape(-1, H_sp * W_sp, C)
    return x


def window_merge(xw, H, W, H_sp, W_sp):
    # inverse of window_partition; matches windows2img.
    C = xw.shape[-1]
    B = xw.shape[0] // ((H // H_sp) * (W // W_sp))
    x = xw.reshape(B, H // H_sp, W // W_sp, H_sp, W_sp, C)
    x = x.transpose(0, 1, 3, 2, 4, 5).reshape(B, H * W, C)
    return x


def lepe_attention(q, k, v, idx, reso, split_size, num_heads, dw_w, dw_b):
    if idx == -1:
        H_sp, W_sp = reso, reso
    elif idx == 0:
        H_sp, W_sp = reso, split_size
    else:
        H_sp, W_sp = split_size, reso
    C = q.shape[-1]
    scale = (C // num_heads) ** (-0.5)
    qw = window_partition(q, reso, reso, H_sp, W_sp)
    kw = window_partition(k, reso, reso, H_sp, W_sp)
    vw = window_partition(v, reso, reso, H_sp, W_sp)
    # Reference: idx == 0 -> attn @ conv_v only (the conv output is computed but never
    # used there), so we skip both the conv and its DMA for that branch.
    use_lepe = (idx != 0)
    lepe = None
    if use_lepe:
        lepe = dwconv_pallas(vw.reshape(-1, H_sp, W_sp, C), dw_w, dw_b)
        lepe = lepe.reshape(-1, H_sp * W_sp, C)
    out = window_attention_pallas(qw, kw, vw, lepe, scale, num_heads, use_lepe)
    return window_merge(out, reso, reso, H_sp, W_sp)


# ----------------------------------------------------------------------------
# CSWinBlock forward
# ----------------------------------------------------------------------------
def cswin_block_forward(x, conv_out, p, *, reso, split_size, num_heads):
    B, L, C = x.shape
    branch_num = 1 if reso == split_size else 2

    v = linear_ln_pallas(conv_out, p["lk_w"], p["norm4_g"], p["norm4_b"])   # lk (no bias) + norm4
    qk = ln_linear_pallas(x, p["norm1_g"], p["norm1_b"], p["qkv_w"])        # norm1 + qkv (no bias)
    q, k = qk[..., :C], qk[..., C:]

    # TODO(synk): the reference forward calls attns[i](qk_slice, v_slice), which would be a
    # TypeError for LePEAttention.forward(q, k, v); we implement the intended semantics
    # q = qk[0], k = qk[1], v = v[0].
    if branch_num == 2:
        h = C // 2
        x1 = lepe_attention(q[..., :h], k[..., :h], v[..., :h], 0, reso, split_size,
                            num_heads // 2, p["dw_w0"], p["dw_b0"])
        x2 = lepe_attention(q[..., h:], k[..., h:], v[..., h:], 1, reso, split_size,
                            num_heads // 2, p["dw_w1"], p["dw_b1"])
        branches = [x1, x2]
    else:
        branches = [lepe_attention(q, k, v, -1, reso, split_size, num_heads,
                                   p["dw_w0"], p["dw_b0"])]

    # proj(+implicit concat) + residual + norm2 + MLP + residual, fused in one kernel.
    x = proj_res_ln_mlp_pallas(x, branches, p["proj_w"], p["proj_b"],
                               p["norm2_g"], p["norm2_b"],
                               p["fc1_w"], p["fc1_b"], p["fc2_w"], p["fc2_b"])
    return x


# ----------------------------------------------------------------------------
# main
# ----------------------------------------------------------------------------
if __name__ == "__main__":
    B, reso, dim, conv_dim, num_heads, split_size = 2, 8, 32, 16, 4, 4
    L = reso * reso
    mlp_hidden = int(dim * 4.0)
    dimb = dim // 2   # per-branch channels (branch_num = 2 since reso != split_size)

    key = jax.random.PRNGKey(0)
    ks = jax.random.split(key, 18)
    f32 = jnp.float32
    params = {
        "lk_w":   0.02 * jax.random.normal(ks[0], (conv_dim, dim), f32),
        "norm1_g": 1.0 + 0.02 * jax.random.normal(ks[1], (dim,), f32),
        "norm1_b": 0.02 * jax.random.normal(ks[2], (dim,), f32),
        "norm4_g": 1.0 + 0.02 * jax.random.normal(ks[3], (dim,), f32),
        "norm4_b": 0.02 * jax.random.normal(ks[4], (dim,), f32),
        "norm2_g": 1.0 + 0.02 * jax.random.normal(ks[5], (dim,), f32),
        "norm2_b": 0.02 * jax.random.normal(ks[6], (dim,), f32),
        "qkv_w":  0.02 * jax.random.normal(ks[7], (dim, 2 * dim), f32),
        "proj_w": 0.02 * jax.random.normal(ks[8], (dim, dim), f32),
        "proj_b": 0.02 * jax.random.normal(ks[9], (dim,), f32),
        "dw_w0":  0.1 * jax.random.normal(ks[10], (3, 3, dimb), f32),   # depthwise (kh, kw, C)
        "dw_b0":  0.02 * jax.random.normal(ks[11], (dimb,), f32),
        "dw_w1":  0.1 * jax.random.normal(ks[12], (3, 3, dimb), f32),
        "dw_b1":  0.02 * jax.random.normal(ks[13], (dimb,), f32),
        "fc1_w":  0.02 * jax.random.normal(ks[14], (dim, mlp_hidden), f32),
        "fc1_b":  jnp.zeros((mlp_hidden,), f32),
        "fc2_w":  0.02 * jax.random.normal(ks[15], (mlp_hidden, dim), f32),
        "fc2_b":  jnp.zeros((dim,), f32),
    }

    x = jax.random.normal(ks[16], (B, L, dim), f32)
    conv_out = jax.random.normal(ks[17], (B, L, conv_dim), f32)

    out = cswin_block_forward(x, conv_out, params,
                              reso=reso, split_size=split_size, num_heads=num_heads)
    out = jax.block_until_ready(out)
    assert out.shape == (B, L, dim)
    assert bool(jnp.all(jnp.isfinite(out)))
    print("KERNEL_OK")
</pallas_src>

<mosaic_0001>
module attributes {stable_mosaic.version = 11 : i64} {
  func.func @_linear_ln_kernel(%arg0: i32, %arg1: memref<128x16xf32, #tpu.memory_space<vmem>>, %arg2: memref<16x32xf32, #tpu.memory_space<vmem>>, %arg3: memref<1x32xf32, #tpu.memory_space<vmem>>, %arg4: memref<1x32xf32, #tpu.memory_space<vmem>>, %arg5: memref<128x32xf32, #tpu.memory_space<vmem>>) attributes {dimension_semantics = [#tpu.dimension_semantics<parallel>], iteration_bounds = array<i64: 1>, scalar_prefetch = 0 : i64, scratch_operands = 0 : i64, tpu.core_type = #tpu.core_type<tc>, window_params = [{transform_indices = @transform_0, window_bounds = array<i64: 128, 16>}, {pipeline_mode = #tpu.pipeline_mode<synchronous>, transform_indices = @transform_1, window_bounds = array<i64: 16, 32>}, {pipeline_mode = #tpu.pipeline_mode<synchronous>, transform_indices = @transform_2, window_bounds = array<i64: 1, 32>}, {pipeline_mode = #tpu.pipeline_mode<synchronous>, transform_indices = @transform_3, window_bounds = array<i64: 1, 32>}, {transform_indices = @transform_4, window_bounds = array<i64: 128, 32>}]} {
    %c0 = arith.constant 0 : index
    %c0_0 = arith.constant 0 : index
    %0 = vector.load %arg1[%c0, %c0_0] : memref<128x16xf32, #tpu.memory_space<vmem>>, vector<128x16xf32>
    %c0_1 = arith.constant 0 : index
    %c0_2 = arith.constant 0 : index
    %1 = vector.load %arg2[%c0_1, %c0_2] : memref<16x32xf32, #tpu.memory_space<vmem>>, vector<16x32xf32>
    %cst = arith.constant dense<0.000000e+00> : vector<128x32xf32>
    %2 = tpu.matmul %0, %1, %cst {dimension_numbers = #tpu.dot_dimension_numbers<[1], [0], [0], [1], [0, 0, 1, 1], [], []>} : vector<128x16xf32>, vector<16x32xf32>, vector<128x32xf32> -> vector<128x32xf32>
    %c0_3 = arith.constant 0 : index
    %c0_4 = arith.constant 0 : index
    %3 = vector.load %arg3[%c0_3, %c0_4] : memref<1x32xf32, #tpu.memory_space<vmem>>, vector<1x32xf32>
    %c0_5 = arith.constant 0 : index
    %c0_6 = arith.constant 0 : index
    %4 = vector.load %arg4[%c0_5, %c0_6] : memref<1x32xf32, #tpu.memory_space<vmem>>, vector<1x32xf32>
    %cst_7 = arith.constant dense<0.000000e+00> : vector<128xf32>
    %5 = vector.multi_reduction <add>, %2, %cst_7 [1] : vector<128x32xf32> to vector<128xf32>
    %6 = vector.shape_cast %5 : vector<128xf32> to vector<128x1xf32>
    %cst_8 = arith.constant 3.200000e+01 : f32
    %7 = vector.broadcast %cst_8 : f32 to vector<128x1xf32>
    %8 = arith.divf %6, %7 : vector<128x1xf32>
    %9 = vector.broadcast %8 : vector<128x1xf32> to vector<128x32xf32>
    %10 = arith.subf %2, %9 : vector<128x32xf32>
    %11 = arith.mulf %10, %10 : vector<128x32xf32>
    %cst_9 = arith.constant dense<0.000000e+00> : vector<128xf32>
    %12 = vector.multi_reduction <add>, %11, %cst_9 [1] : vector<128x32xf32> to vector<128xf32>
    %13 = vector.shape_cast %12 : vector<128xf32> to vector<128x1xf32>
    %cst_10 = arith.constant 3.200000e+01 : f32
    %14 = vector.broadcast %cst_10 : f32 to vector<128x1xf32>
    %15 = arith.divf %13, %14 : vector<128x1xf32>
    %16 = vector.broadcast %8 : vector<128x1xf32> to vector<128x32xf32>
    %17 = arith.subf %2, %16 : vector<128x32xf32>
    %cst_11 = arith.constant 9.99999974E-6 : f32
    %18 = vector.broadcast %cst_11 : f32 to vector<128x1xf32>
    %19 = arith.addf %15, %18 : vector<128x1xf32>
    %20 = math.rsqrt %19 : vector<128x1xf32>
    %21 = vector.broadcast %20 : vector<128x1xf32> to vector<128x32xf32>
    %22 = arith.mulf %17, %21 : vector<128x32xf32>
    %23 = vector.broadcast %3 : vector<1x32xf32> to vector<128x32xf32>
    %24 = arith.mulf %22, %23 : vector<128x32xf32>
    %25 = vector.broadcast %4 : vector<1x32xf32> to vector<128x32xf32>
    %26 = arith.addf %24, %25 : vector<128x32xf32>
    %c0_12 = arith.constant 0 : index
    %c0_13 = arith.constant 0 : index
    %27 = vector.load %arg5[%c0_12, %c0_13] : memref<128x32xf32, #tpu.memory_space<vmem>>, vector<128x32xf32>
    tpu.vector_store %arg5[%c0_12, %c0_13], %26 {strides = array<i32>} : memref<128x32xf32, #tpu.memory_space<vmem>>, vector<128x32xf32>,
    return
  }
  func.func @transform_0(%arg0: i32) -> (i32, i32) {
    %c0_i32 = arith.constant 0 : i32
    %c0_i32_0 = arith.constant 0 : i32
    return %arg0, %c0_i32 : i32, i32
  }
  func.func @transform_1(%arg0: i32) -> (i32, i32) {
    %c0_i32 = arith.constant 0 : i32
    %c0_i32_0 = arith.constant 0 : i32
    %c0_i32_1 = arith.constant 0 : i32
    return %c0_i32, %c0_i32_0 : i32, i32
  }
  func.func @transform_2(%arg0: i32) -> (i32, i32) {
    %c0_i32 = arith.constant 0 : i32
    %c0_i32_0 = arith.constant 0 : i32
    %c0_i32_1 = arith.constant 0 : i32
    return %c0_i32, %c0_i32_0 : i32, i32
  }
  func.func @transform_3(%arg0: i32) -> (i32, i32) {
    %c0_i32 = arith.constant 0 : i32
    %c0_i32_0 = arith.constant 0 : i32
    %c0_i32_1 = arith.constant 0 : i32
    return %c0_i32, %c0_i32_0 : i32, i32
  }
  func.func @transform_4(%arg0: i32) -> (i32, i32) {
    %c0_i32 = arith.constant 0 : i32
    %c0_i32_0 = arith.constant 0 : i32
    return %arg0, %c0_i32 : i32, i32
  }
}

</mosaic_0001>

<bundles_post_ra>
// kernel: tpu_custom_call.1
= control target key start
LH: loop header
LB: loop body
LE: loop exit
PB: predicated region body
PF: predicated region fallthrough
CT: control target
= control target key end

     0   :  { %vm35_vm0 = vcmask 130048   ;;  %vm231_vm1 = vcmask 261120   ;;  %s962_s1 = inlined_call_operand.vmem [shape: f32[16,32], index: 1, kind: input, shape index: {}]   ;;  %s963_s0 = inlined_call_operand.vmem [shape: f32[128,16], index: 0, kind: input, shape index: {}]   ;;  %s964_s2 = inlined_call_operand.vmem [shape: f32[1,32], index: 2, kind: input, shape index: {}]   ;;  %s965_s3 = inlined_call_operand.vmem [shape: f32[1,32], index: 3, kind: input, shape index: {}]   ;;  %s966_s4 = inlined_call_operand.vmem [shape: f32[128,32], index: 4, kind: output, shape index: {}]  }
   0x1   :  { %v34_v0 = vld [vmem:[%s962_s1 + $0x8] sm:$0xff]  ;;  %v33_v1 = vld [vmem:[%s962_s1] sm:$0xff]  ;;  %v19_v6 = vld [vmem:[%s963_s0 + $0x10] sm:$0xff] }
   0x2   :  { %541 = vmatprep.subr.mxu0 %v34_v0  ;;  %569 = vmatprep.subr.mxu1 %v34_v0  ;;  %v17_v2 = vld [vmem:[%s963_s0] sm:$0xff]  ;;  %v18_v4 = vld [vmem:[%s963_s0 + $0x8] sm:$0xff]  ;;  %v27_v7 = vld [vmem:[%s963_s0 + $0x50] sm:$0xff] }
   0x3   :  { %542 = vmatpush3.msra.mxu0 %v34_v0  ;;  %571 = vmatpush3.msra.mxu1 %v34_v0  ;;  %v25_v3 = vld [vmem:[%s963_s0 + $0x40] sm:$0xff]  ;;  %v26_v5 = vld [vmem:[%s963_s0 + $0x48] sm:$0xff]  ;;  %v20_v8 = vld [vmem:[%s963_s0 + $0x18] sm:$0xff] }
   0x4   :  { %543 = vmatprep.subr.mxu0 %v33_v1  ;;  %570 = vmatprep.subr.mxu1 %v33_v1  ;;  %v28_v9 = vld [vmem:[%s963_s0 + $0x58] sm:$0xff]  ;;  %v21_v10 = vld [vmem:[%s963_s0 + $0x20] sm:$0xff]  ;;  %v22_v12 = vld [vmem:[%s963_s0 + $0x28] sm:$0xff] }
   0x5   :  { %544 = vmatpush3.msra.mxu0 %v33_v1  ;;  %572 = vmatpush3.msra.mxu1 %v33_v1  ;;  %v29_v11 = vld [vmem:[%s963_s0 + $0x60] sm:$0xff]  ;;  %v30_v13 = vld [vmem:[%s963_s0 + $0x68] sm:$0xff]  ;;  %v23_v14 = vld [vmem:[%s963_s0 + $0x30] sm:$0xff] }
   0x6   :  { %545 = vmatprep.mubr.msk.f32.mxu0 %vm35_vm0, %v17_v2  ;;  %557 = vmatprep.mubr.msk.f32.mxu1 %vm35_vm0, %v25_v3  ;;  %v31_v15 = vld [vmem:[%s963_s0 + $0x70] sm:$0xff]  ;;  %v24_v16 = vld [vmem:[%s963_s0 + $0x38] sm:$0xff] }
   0x7   :  { %546 = vmatmul.mubr.msk.f32.vlgmr.msra.gmra.mxu0 %vm35_vm0, %v18_v4  ;;  %558 = vmatmul.mubr.msk.f32.vlgmr.msra.gmra.mxu1 %vm35_vm0, %v26_v5  ;;  %v32_v17 = vld [vmem:[%s963_s0 + $0x78] sm:$0xff] }
   0x8   :  { %548 = vmatprep.mubr.msk.f32.mxu0 %vm35_vm0, %v19_v6  ;;  %560 = vmatprep.mubr.msk.f32.mxu1 %vm35_vm0, %v27_v7 }
   0xb   :  { %549 = vmatmul.mubr.msk.f32.gmra.mxu0 %vm35_vm0, %v20_v8  ;;  %561 = vmatmul.mubr.msk.f32.gmra.mxu1 %vm35_vm0, %v28_v9 }
   0xc   :  { %551 = vmatprep.mubr.msk.f32.mxu0 %vm35_vm0, %v21_v10  ;;  %563 = vmatprep.mubr.msk.f32.mxu1 %vm35_vm0, %v29_v11 }
   0xf   :  { %552 = vmatmul.mubr.msk.f32.gmra.mxu0 %vm35_vm0, %v22_v12  ;;  %564 = vmatmul.mubr.msk.f32.gmra.mxu1 %vm35_vm0, %v30_v13 }
  0x10   :  { %554 = vmatprep.mubr.msk.f32.mxu0 %vm35_vm0, %v23_v14  ;;  %566 = vmatprep.mubr.msk.f32.mxu1 %vm35_vm0, %v31_v15 }
  0x13   :  { %555 = vmatmul.mubr.msk.f32.gmra.mxu0 %vm35_vm0, %v24_v16  ;;  %567 = vmatmul.mubr.msk.f32.gmra.mxu1 %vm35_vm0, %v32_v17 }
  0xc7   :  { %v547_v18 = vpop.f32.mrf.mxu0  ;;  %v559_v19 = vpop.f32.mrf.mxu1 }
  0xc8   :  { %v259_v20 = vsel %vm231_vm1, %v559_v19, 0.0  ;;  %v235_v21 = vsel %vm231_vm1, %v547_v18, 0.0 }
  0xc9   :  { %260 = vadd.xlane.f32.xlu1 %v259_v20  ;;  %236 = vadd.xlane.f32.xlu0 %v235_v21  ;;  %v150_v22 = vpop.f32.mrf.mxu0  ;;  %v702_v23 = vpop.f32.mrf.mxu1 }
  0xca   :  { %v232_v25 = vsel %vm231_vm1, %v150_v22, 0.0  ;;  %v256_v31 = vsel %vm231_vm1, %v702_v23, 0.0 }
  0xcb   :  { %v550_v24 = vpop.f32.mrf.mxu0  ;;  %v562_v27 = vpop.f32.mrf.mxu1 }
  0xcc   :  { %v241_v26 = vsel %vm231_vm1, %v550_v24, 0.0  ;;  %v265_v29 = vsel %vm231_vm1, %v562_v27, 0.0 }
  0xcd   :  { %233 = vadd.xlane.f32.xlu0 %v232_v25  ;;  %242 = vadd.xlane.f32.xlu1 %v241_v26  ;;  %v706_v28 = vpop.f32.mrf.mxu0  ;;  %v713_v32 = vpop.f32.mrf.mxu1 }
  0xce   :  { %v262_v35 = vsel %vm231_vm1, %v713_v32, 0.0  ;;  %v238_v36 = vsel %vm231_vm1, %v706_v28, 0.0 }
  0xcf   :  { %v709_v30 = vpop.f32.mrf.mxu0  ;;  %v717_v34 = vpop.f32.mrf.mxu1 }
  0xd0   :  { %v247_v37 = vsel %vm231_vm1, %v709_v30, 0.0  ;;  %v271_v41 = vsel %vm231_vm1, %v717_v34, 0.0 }
  0xd1   :  { %257 = vadd.xlane.f32.xlu0 %v256_v31  ;;  %266 = vadd.xlane.f32.xlu1 %v265_v29  ;;  %v715_v33 = vpop.f32.mrf.mxu0  ;;  %v727_v39 = vpop.f32.mrf.mxu1 }
  0xd2   :  { %v244_v38 = vsel %vm231_vm1, %v715_v33, 0.0  ;;  %v268_v42 = vsel %vm231_vm1, %v727_v39, 0.0 }
  0xd3   :  { %v729_v40 = vpop.f32.mrf.mxu0  ;;  %v737_v44 = vpop.f32.mrf.mxu1 }
  0xd4   :  { %v253_v45 = vsel %vm231_vm1, %v729_v40, 0.0  ;;  %v277_v48 = vsel %vm231_vm1, %v737_v44, 0.0 }
  0xd5   :  { %263 = vadd.xlane.f32.xlu0 %v262_v35  ;;  %239 = vadd.xlane.f32.xlu1 %v238_v36  ;;  %v735_v43 = vpop.f32.mrf.mxu0  ;;  %v743_v47 = vpop.f32.mrf.mxu1 }
  0xd6   :  { %v250_v46 = vsel %vm231_vm1, %v735_v43, 0.0  ;;  %v274_v49 = vsel %vm231_vm1, %v743_v47, 0.0 }
  0xd9   :  { %248 = vadd.xlane.f32.xlu1 %v247_v37  ;;  %245 = vadd.xlane.f32.xlu0 %v244_v38 }
  0xdd   :  { %272 = vadd.xlane.f32.xlu1 %v271_v41  ;;  %269 = vadd.xlane.f32.xlu0 %v268_v42 }
  0xe1   :  { %254 = vadd.xlane.f32.xlu1 %v253_v45  ;;  %251 = vadd.xlane.f32.xlu0 %v250_v46 }
  0xe5   :  { %278 = vadd.xlane.f32.xlu1 %v277_v48  ;;  %275 = vadd.xlane.f32.xlu0 %v274_v49 }
 0x152   :  { %v261_v50 = vpop.xlane.xlu1 %260  ;;  %v237_v51 = vpop.xlane.xlu0 %236 }
 0x153   :  { %v290_v52 = vmul.f32 0.03125, %v261_v50  ;;  %v282_v53 = vmul.f32 0.03125, %v237_v51 }
 0x155   :  { %v749_v54 = vsub.f32 %v559_v19, %v290_v52  ;;  %v751_v55 = vsub.f32 %v547_v18, %v282_v53 }
 0x156   :  { %v234_v56 = vpop.xlane.xlu0 %233  ;;  %v243_v57 = vpop.xlane.xlu1 %242 }
 0x157   :  { %v281_v58 = vmul.f32 0.03125, %v234_v56  ;;  %v284_v59 = vmul.f32 0.03125, %v243_v57  ;;  %v314_v60 = vmul.f32 %v751_v55, %v751_v55  ;;  %v322_v0 = vmul.f32 %v749_v54, %v749_v54 }
 0x159   :  { %v755_v61 = vsub.f32 %v150_v22, %v281_v58  ;;  %v757_v62 = vsub.f32 %v550_v24, %v284_v59  ;;  %v332_v63 = vsel %vm231_vm1, %v314_v60, 0.0  ;;  %v356_v9 = vsel %vm231_vm1, %v322_v0, 0.0 }
 0x15a   :  { %v258_v1 = vpop.xlane.xlu0 %257  ;;  %v267_v2 = vpop.xlane.xlu1 %266  ;;  %333 = vadd.xlane.f32.xlu1 %v332_v63 }
 0x15b   :  { %v289_v3 = vmul.f32 0.03125, %v258_v1  ;;  %v292_v4 = vmul.f32 0.03125, %v267_v2  ;;  %v313_v5 = vmul.f32 %v755_v61, %v755_v61  ;;  %v316_v6 = vmul.f32 %v757_v62, %v757_v62 }
 0x15d   :  { %v767_v7 = vsub.f32 %v702_v23, %v289_v3  ;;  %v769_v8 = vsub.f32 %v562_v27, %v292_v4  ;;  %v329_v10 = vsel %vm231_vm1, %v313_v5, 0.0  ;;  %v338_v16 = vsel %vm231_vm1, %v316_v6, 0.0 }
 0x15e   :  { %v264_v11 = vpop.xlane.xlu0 %263  ;;  %v240_v12 = vpop.xlane.xlu1 %239  ;;  %357 = vadd.xlane.f32.xlu1 %v356_v9  ;;  %330 = vadd.xlane.f32.xlu0 %v329_v10 }
 0x15f   :  { %v291_v13 = vmul.f32 0.03125, %v264_v11  ;;  %v283_v14 = vmul.f32 0.03125, %v240_v12  ;;  %v321_v15 = vmul.f32 %v767_v7, %v767_v7  ;;  %v324_v20 = vmul.f32 %v769_v8, %v769_v8 }
 0x161   :  { %v777_v17 = vsub.f32 %v713_v32, %v291_v13  ;;  %v780_v18 = vsub.f32 %v706_v28, %v283_v14  ;;  %v353_v19 = vsel %vm231_vm1, %v321_v15, 0.0  ;;  %v362_v29 = vsel %vm231_vm1, %v324_v20, 0.0 }
 0x162   :  { %v249_v21 = vpop.xlane.xlu1 %248  ;;  %v246_v22 = vpop.xlane.xlu0 %245  ;;  %339 = vadd.xlane.f32.xlu1 %v338_v16  ;;  %354 = vadd.xlane.f32.xlu0 %v353_v19 }
 0x163   :  { %v286_v23 = vmul.f32 0.03125, %v249_v21  ;;  %v285_v24 = vmul.f32 0.03125, %v246_v22  ;;  %v315_v25 = vmul.f32 %v780_v18, %v780_v18  ;;  %v323_v26 = vmul.f32 %v777_v17, %v777_v17 }
 0x165   :  { %v790_v27 = vsub.f32 %v709_v30, %v286_v23  ;;  %v793_v28 = vsub.f32 %v715_v33, %v285_v24  ;;  %v335_v31 = vsel %vm231_vm1, %v315_v25, 0.0  ;;  %v359_v41 = vsel %vm231_vm1, %v323_v26, 0.0 }
 0x166   :  { %v273_v32 = vpop.xlane.xlu1 %272  ;;  %v270_v35 = vpop.xlane.xlu0 %269  ;;  %363 = vadd.xlane.f32.xlu1 %v362_v29  ;;  %336 = vadd.xlane.f32.xlu0 %v335_v31 }
 0x167   :  { %v294_v36 = vmul.f32 0.03125, %v273_v32  ;;  %v293_v37 = vmul.f32 0.03125, %v270_v35  ;;  %v318_v38 = vmul.f32 %v790_v27, %v790_v27  ;;  %v317_v45 = vmul.f32 %v793_v28, %v793_v28 }
 0x169   :  { %v801_v30 = vsub.f32 %v717_v34, %v294_v36  ;;  %v804_v33 = vsub.f32 %v727_v39, %v293_v37  ;;  %v344_v42 = vsel %vm231_vm1, %v318_v38, 0.0  ;;  %v341_v56 = vsel %vm231_vm1, %v317_v45, 0.0  ;;  %v843_v45 = vld [vmem:[%s964_s2] ss:$0 sm:$0xff] }
 0x16a   :  { %345 = vadd.xlane.f32.xlu1 %v344_v42  ;;  %v255_v46 = vpop.xlane.xlu1 %254  ;;  %360 = vadd.xlane.f32.xlu0 %v359_v41  ;;  %v252_v48 = vpop.xlane.xlu0 %251 }
 0x16b   :  { %v288_v49 = vmul.f32 0.03125, %v255_v46  ;;  %v287_v50 = vmul.f32 0.03125, %v252_v48  ;;  %v326_v51 = vmul.f32 %v801_v30, %v801_v30  ;;  %v325_v34 = vmul.f32 %v804_v33, %v804_v33 }
 0x16d   :  { %v814_v39 = vsub.f32 %v729_v40, %v288_v49  ;;  %v817_v52 = vsub.f32 %v735_v43, %v287_v50  ;;  %v368_v53 = vsel %vm231_vm1, %v326_v51, 0.0  ;;  %v365_v0 = vsel %vm231_vm1, %v325_v34, 0.0  ;;  %v849_v50 = vld [vmem:[%s965_s3] ss:$0 sm:$0xff] }
 0x16e   :  { %369 = vadd.xlane.f32.xlu1 %v368_v53  ;;  %v279_v57 = vpop.xlane.xlu1 %278  ;;  %342 = vadd.xlane.f32.xlu0 %v341_v56  ;;  %v276_v58 = vpop.xlane.xlu0 %275 }
 0x16f   :  { %v296_v59 = vmul.f32 0.03125, %v279_v57  ;;  %v295_v60 = vmul.f32 0.03125, %v276_v58  ;;  %v320_v63 = vmul.f32 %v814_v39, %v814_v39  ;;  %v319_v2 = vmul.f32 %v817_v52, %v817_v52 }
 0x171   :  { %v825_v40 = vsub.f32 %v737_v44, %v296_v59  ;;  %v828_v43 = vsub.f32 %v743_v47, %v295_v60  ;;  %v350_v1 = vsel %vm231_vm1, %v320_v63, 0.0  ;;  %v347_v5 = vsel %vm231_vm1, %v319_v2, 0.0 }
 0x172   :  { %351 = vadd.xlane.f32.xlu1 %v350_v1  ;;  %366 = vadd.xlane.f32.xlu0 %v365_v0 }
 0x173   :  { %v328_v3 = vmul.f32 %v825_v40, %v825_v40  ;;  %v327_v44 = vmul.f32 %v828_v43, %v828_v43 }
 0x175   :  { %v374_v4 = vsel %vm231_vm1, %v328_v3, 0.0  ;;  %v371_v47 = vsel %vm231_vm1, %v327_v44, 0.0 }
 0x176   :  { %375 = vadd.xlane.f32.xlu1 %v374_v4  ;;  %348 = vadd.xlane.f32.xlu0 %v347_v5 }
 0x17a   :  { %372 = vadd.xlane.f32.xlu0 %v371_v47 }
 0x1e3   :  { %v334_v6 = vpop.xlane.xlu1 %333 }
 0x1e4   :  { %v378_v9 = vmul.f32 0.03125, %v334_v6 }
 0x1e6   :  { %v394_v10 = vadd.f32 1e-05, %v378_v9 }
 0x1e7   :  { %v358_v11 = vpop.xlane.xlu1 %357  ;;  %v331_v12 = vpop.xlane.xlu0 %330 }
 0x1e8   :  { %573 = vrsqrt.f32 %v394_v10  ;;  %v386_v13 = vmul.f32 0.03125, %v358_v11  ;;  %v377_v14 = vmul.f32 0.03125, %v331_v12 }
 0x1ea   :  { %v402_v15 = vadd.f32 1e-05, %v386_v13  ;;  %v393_v16 = vadd.f32 1e-05, %v377_v14 }
 0x1eb   :  { %v340_v19 = vpop.xlane.xlu1 %339  ;;  %v355_v20 = vpop.xlane.xlu0 %354 }
 0x1ec   :  { %575 = vrsqrt.f32 %v402_v15  ;;  %v380_v21 = vmul.f32 0.03125, %v340_v19  ;;  %v385_v22 = vmul.f32 0.03125, %v355_v20 }
 0x1ed   :  { %577 = vrsqrt.f32 %v393_v16 }
 0x1ee   :  { %v396_v23 = vadd.f32 1e-05, %v380_v21  ;;  %v401_v24 = vadd.f32 1e-05, %v385_v22 }
 0x1ef   :  { %v364_v25 = vpop.xlane.xlu1 %363  ;;  %v337_v26 = vpop.xlane.xlu0 %336 }
 0x1f0   :  { %579 = vrsqrt.f32 %v396_v23  ;;  %v388_v29 = vmul.f32 0.03125, %v364_v25  ;;  %v379_v31 = vmul.f32 0.03125, %v337_v26 }
 0x1f1   :  { %581 = vrsqrt.f32 %v401_v24 }
 0x1f2   :  { %v404_v32 = vadd.f32 1e-05, %v388_v29  ;;  %v395_v35 = vadd.f32 1e-05, %v379_v31 }
 0x1f3   :  { %v346_v36 = vpop.xlane.xlu1 %345  ;;  %v361_v37 = vpop.xlane.xlu0 %360 }
 0x1f4   :  { %583 = vrsqrt.f32 %v404_v32  ;;  %v382_v38 = vmul.f32 0.03125, %v346_v36  ;;  %v387_v41 = vmul.f32 0.03125, %v361_v37 }
 0x1f5   :  { %v574_v42 = vpop.eup %573  ;;  %585 = vrsqrt.f32 %v395_v35 }
 0x1f6   :  { %v426_v46 = vmul.f32 %v574_v42, %v751_v55  ;;  %v398_v48 = vadd.f32 1e-05, %v382_v38  ;;  %v403_v49 = vadd.f32 1e-05, %v387_v41 }
 0x1f7   :  { %v370_v51 = vpop.xlane.xlu1 %369  ;;  %v343_v34 = vpop.xlane.xlu0 %342 }
 0x1f8   :  { %v448_v53 = vmul.f32 %v843_v45, %v426_v46  ;;  %587 = vrsqrt.f32 %v398_v48  ;;  %v390_v56 = vmul.f32 0.03125, %v370_v51  ;;  %v381_v57 = vmul.f32 0.03125, %v343_v34 }
 0x1f9   :  { %v576_v58 = vpop.eup %575  ;;  %589 = vrsqrt.f32 %v403_v49 }
 0x1fa   :  { %v578_v59 = vpop.eup %577  ;;  %v470_v60 = vadd.f32 %v849_v50, %v448_v53  ;;  %v434_v55 = vmul.f32 %v576_v58, %v749_v54  ;;  %v406_v63 = vadd.f32 1e-05, %v390_v56  ;;  %v397_v0 = vadd.f32 1e-05, %v381_v57 }
 0x1fb   :  { %v425_v1 = vmul.f32 %v578_v59, %v755_v61  ;;  %v352_v2 = vpop.xlane.xlu1 %351  ;;  %v367_v3 = vpop.xlane.xlu0 %366 }
 0x1fc   :  { %486 = vst.msk [vmem:[%s966_s4 + $0x8] sm:$0xff] %vm231_vm1, %v470_v60  ;;  %v456_v4 = vmul.f32 %v843_v45, %v434_v55  ;;  %591 = vrsqrt.f32 %v406_v63  ;;  %v384_v5 = vmul.f32 0.03125, %v352_v2  ;;  %v389_v44 = vmul.f32 0.03125, %v367_v3 }
 0x1fd   :  { %v580_v47 = vpop.eup %579  ;;  %v447_v6 = vmul.f32 %v843_v45, %v425_v1  ;;  %593 = vrsqrt.f32 %v397_v0 }
 0x1fe   :  { %v582_v54 = vpop.eup %581  ;;  %v478_v9 = vadd.f32 %v849_v50, %v456_v4  ;;  %v428_v61 = vmul.f32 %v580_v47, %v757_v62  ;;  %v400_v10 = vadd.f32 1e-05, %v384_v5  ;;  %v405_v11 = vadd.f32 1e-05, %v389_v44 }
 0x1ff   :  { %v469_v12 = vadd.f32 %v849_v50, %v447_v6  ;;  %v433_v13 = vmul.f32 %v582_v54, %v767_v7  ;;  %v376_v14 = vpop.xlane.xlu1 %375  ;;  %v349_v15 = vpop.xlane.xlu0 %348 }
 0x200   :  { %494 = vst.msk [vmem:[%s966_s4 + $0x48] sm:$0xff] %vm231_vm1, %v478_v9  ;;  %v450_v16 = vmul.f32 %v843_v45, %v428_v61  ;;  %595 = vrsqrt.f32 %v400_v10  ;;  %v392_v19 = vmul.f32 0.03125, %v376_v14  ;;  %v383_v20 = vmul.f32 0.03125, %v349_v15 }
 0x201   :  { %v584_v21 = vpop.eup %583  ;;  %485 = vst.msk [vmem:[%s966_s4] sm:$0xff] %vm231_vm1, %v469_v12  ;;  %v455_v62 = vmul.f32 %v843_v45, %v433_v13  ;;  %597 = vrsqrt.f32 %v405_v11 }
 0x202   :  { %v586_v7 = vpop.eup %585  ;;  %v472_v22 = vadd.f32 %v849_v50, %v450_v16  ;;  %v436_v23 = vmul.f32 %v584_v21, %v769_v8  ;;  %v408_v24 = vadd.f32 1e-05, %v392_v19  ;;  %v399_v25 = vadd.f32 1e-05, %v383_v20 }
 0x203   :  { %v477_v26 = vadd.f32 %v849_v50, %v455_v62  ;;  %v427_v29 = vmul.f32 %v586_v7, %v780_v18  ;;  %v373_v31 = vpop.xlane.xlu0 %372 }
 0x204   :  { %488 = vst.msk [vmem:[%s966_s4 + $0x18] sm:$0xff] %vm231_vm1, %v472_v22  ;;  %v458_v32 = vmul.f32 %v843_v45, %v436_v23  ;;  %599 = vrsqrt.f32 %v408_v24  ;;  %v391_v35 = vmul.f32 0.03125, %v373_v31 }
 0x205   :  { %v588_v36 = vpop.eup %587  ;;  %493 = vst.msk [vmem:[%s966_s4 + $0x40] sm:$0xff] %vm231_vm1, %v477_v26  ;;  %v449_v8 = vmul.f32 %v843_v45, %v427_v29  ;;  %601 = vrsqrt.f32 %v399_v25 }
 0x206   :  { %v590_v18 = vpop.eup %589  ;;  %v480_v37 = vadd.f32 %v849_v50, %v458_v32  ;;  %v430_v38 = vmul.f32 %v588_v36, %v790_v27  ;;  %v407_v41 = vadd.f32 1e-05, %v391_v35 }
 0x207   :  { %v471_v42 = vadd.f32 %v849_v50, %v449_v8  ;;  %v435_v46 = vmul.f32 %v590_v18, %v777_v17 }
 0x208   :  { %496 = vst.msk [vmem:[%s966_s4 + $0x58] sm:$0xff] %vm231_vm1, %v480_v37  ;;  %v452_v48 = vmul.f32 %v843_v45, %v430_v38  ;;  %603 = vrsqrt.f32 %v407_v41 }
 0x209   :  { %v592_v49 = vpop.eup %591  ;;  %487 = vst.msk [vmem:[%s966_s4 + $0x10] sm:$0xff] %vm231_vm1, %v471_v42  ;;  %v457_v27 = vmul.f32 %v843_v45, %v435_v46 }
 0x20a   :  { %v594_v51 = vpop.eup %593  ;;  %v474_v34 = vadd.f32 %v849_v50, %v452_v48  ;;  %v438_v17 = vmul.f32 %v592_v49, %v801_v30 }
 0x20b   :  { %v479_v53 = vadd.f32 %v849_v50, %v457_v27  ;;  %v429_v56 = vmul.f32 %v594_v51, %v793_v28 }
 0x20c   :  { %490 = vst.msk [vmem:[%s966_s4 + $0x28] sm:$0xff] %vm231_vm1, %v474_v34  ;;  %v460_v57 = vmul.f32 %v843_v45, %v438_v17 }
 0x20d   :  { %v596_v58 = vpop.eup %595  ;;  %495 = vst.msk [vmem:[%s966_s4 + $0x50] sm:$0xff] %vm231_vm1, %v479_v53  ;;  %v451_v59 = vmul.f32 %v843_v45, %v429_v56 }
 0x20e   :  { %v598_v30 = vpop.eup %597  ;;  %v482_v60 = vadd.f32 %v849_v50, %v460_v57  ;;  %v432_v28 = vmul.f32 %v596_v58, %v814_v39 }
 0x20f   :  { %v473_v55 = vadd.f32 %v849_v50, %v451_v59  ;;  %v437_v63 = vmul.f32 %v598_v30, %v804_v33 }
 0x210   :  { %498 = vst.msk [vmem:[%s966_s4 + $0x68] sm:$0xff] %vm231_vm1, %v482_v60  ;;  %v454_v0 = vmul.f32 %v843_v45, %v432_v28 }
 0x211   :  { %v600_v1 = vpop.eup %599  ;;  %489 = vst.msk [vmem:[%s966_s4 + $0x20] sm:$0xff] %vm231_vm1, %v473_v55  ;;  %v459_v2 = vmul.f32 %v843_v45, %v437_v63 }
 0x212   :  { %v602_v39 = vpop.eup %601  ;;  %v476_v3 = vadd.f32 %v849_v50, %v454_v0  ;;  %v440_v33 = vmul.f32 %v600_v1, %v825_v40 }
 0x213   :  { %v481_v4 = vadd.f32 %v849_v50, %v459_v2  ;;  %v431_v5 = vmul.f32 %v602_v39, %v817_v52 }
 0x214   :  { %492 = vst.msk [vmem:[%s966_s4 + $0x38] sm:$0xff] %vm231_vm1, %v476_v3  ;;  %v462_v44 = vmul.f32 %v843_v45, %v440_v33 }
 0x215   :  { %v604_v47 = vpop.eup %603  ;;  %497 = vst.msk [vmem:[%s966_s4 + $0x60] sm:$0xff] %vm231_vm1, %v481_v4  ;;  %v453_v6 = vmul.f32 %v843_v45, %v431_v5 }
 0x216   :  { %v484_v40 = vadd.f32 %v849_v50, %v462_v44  ;;  %v439_v54 = vmul.f32 %v604_v47, %v828_v43 }
 0x217   :  { %v475_v52 = vadd.f32 %v849_v50, %v453_v6 }
 0x218   :  { %500 = vst.msk [vmem:[%s966_s4 + $0x78] sm:$0xff] %vm231_vm1, %v484_v40  ;;  %v461_v9 = vmul.f32 %v843_v45, %v439_v54 }
 0x219   :  { %491 = vst.msk [vmem:[%s966_s4 + $0x30] sm:$0xff] %vm231_vm1, %v475_v52 }
 0x21a   :  { %v483_v61 = vadd.f32 %v849_v50, %v461_v9 }
 0x21c   :  { %499 = vst.msk [vmem:[%s966_s4 + $0x70] sm:$0xff] %vm231_vm1, %v483_v61 }

</bundles_post_ra>
